<compile_context>
chip_gen: v7x
topology: tpu7x:2x2x1
jax: 0.10.0
libtpu: 0.0.40
codegen_flags: <defaults>
</compile_context>

<pallas_src>
import jax
import jax.numpy as jnp
from jax.experimental import pallas as pl
from jax.experimental.pallas import tpu as pltpu


def _mlp_kernel(x_ref,
                w1_ref, b1_ref,
                w2_ref, b2_ref,
                w3_ref, b3_ref,
                w4_ref, b4_ref,
                o_ref):
    """One batch tile.

    x_ref : [TILE_B, in]   original input dtype (natural layout)
    w1_ref: [in, 64]  w2_ref: [64, 32]          compute dtype (MXU feed)
    w3_ref: [16, 32]  (PyTorch layout; layer-3 dot contracts its last dim)
    b1_ref: [1, 64]   b2_ref: [1, 32]   f32
    b3_ref: [16, 1]   w4_ref: [16, 1]   b4_ref: [1, 1]   f32
    o_ref : [1, TILE_B] f32 lane-dense output row
    """
    cdt = w1_ref.dtype
    # Downcast to the MXU feed dtype in-kernel (no-op when dtypes match).
    x = x_ref[...].astype(cdt)                                    # [T, in]

    # Layer 1: Linear(in, 64) + ReLU   (Dropout(0.2) = identity at inference)
    h = jnp.dot(x, w1_ref[...], preferred_element_type=jnp.float32)
    h = jnp.maximum(h + b1_ref[...], 0.0).astype(cdt)             # [T, 64]

    # Layer 2: Linear(64, 32) + ReLU   (Dropout(0.2) = identity at inference)
    h = jnp.dot(h, w2_ref[...], preferred_element_type=jnp.float32)
    h = jnp.maximum(h + b2_ref[...], 0.0).astype(cdt)             # [T, 32]

    # Layer 3: Linear(32, 16) + ReLU, produced already transposed ([16, T]):
    # contract the activation's feature (last) axis -> transposed-RHS matmul.
    h = jax.lax.dot_general(w3_ref[...], h, (((1,), (1,)), ((), ())),
                            preferred_element_type=jnp.float32)   # [16, T] f32
    h = jnp.maximum(h + b3_ref[...], 0.0)                         # [16, T] f32

    # Layer 4: Linear(16, 1) + Sigmoid -- off the MXU (degenerate N=1).
    # Elementwise multiply + sublane reduce gives a lane-dense [1, T] row.
    logit = jnp.sum(h * w4_ref[...], axis=0, keepdims=True) + b4_ref[...]
    o_ref[...] = jax.nn.sigmoid(logit).astype(o_ref.dtype)        # [1, T]


def _round_up(n, m):
    return ((n + m - 1) // m) * m


def neural_network_forward(x, params, *, tile_b=None,
                           compute_dtype=jnp.bfloat16):
    """Forward pass of the reward-model MLP.

    x: [B, input_size] float array (f32, or bf16 if the producer emits bf16 --
       no wrapper cast/transpose pass is performed over x either way).
    params: PyTorch-layout weights, params["lN"] = (W [out, in], b [out]).
    compute_dtype: dtype fed to the MXU for x and w1..w3.  bf16 is the
      production setting (f32 feed is test-only; on v5e it ~doubles x bytes
      and triples MXU passes).  Post-matmul math stays in f32.
    """
    B, in_size = x.shape
    w1, b1 = params["l1"]
    w2, b2 = params["l2"]
    w3, b3 = params["l3"]
    w4, b4 = params["l4"]

    # ---- batch tiling ------------------------------------------------------
    if tile_b is None:
        # Big tiles amortize the ~0.35us per-grid-step overhead.  Size so the
        # per-tile VMEM working set (x double-buffer + in-kernel f32 dot
        # outputs + bf16 activations + output) stays ~<= 20 MiB, which fits
        # the 32 MiB scoped default on v5e/v6e and on v7x (64 MiB physical).
        per_row = 2 * in_size * x.dtype.itemsize + 2 * in_size + 704
        tile_b = (20 << 20) // per_row
    tile_b = max(128, min(int(tile_b), 16384))
    tile_b = _round_up(tile_b, 128)
    tile_b = min(tile_b, _round_up(B, 128))       # don't over-tile tiny batches
    if B >= 256:
        # v7x megacore: guarantee >= 2 batch tiles so both TensorCores work.
        tile_b = min(tile_b, _round_up(-(-B // 2), 128))
    b_pad = _round_up(B, tile_b)
    num_tiles = b_pad // tile_b

    # Only pad the batch dim when needed (zeros; padded rows are sliced off).
    if b_pad != B:
        x = jnp.pad(x, ((0, b_pad - B), (0, 0)))

    # Tiny weight-side layout prep (negligible vs. the activation stream).
    w1c = w1.T.astype(compute_dtype)                              # [in, 64]
    w2c = w2.T.astype(compute_dtype)                              # [64, 32]
    w3c = w3.astype(compute_dtype)                                # [16, 32]
    b1c = b1.reshape(1, -1).astype(jnp.float32)                   # [1, 64]
    b2c = b2.reshape(1, -1).astype(jnp.float32)                   # [1, 32]
    b3c = b3.reshape(-1, 1).astype(jnp.float32)                   # [16, 1]
    w4c = w4.reshape(-1, 1).astype(jnp.float32)                   # [16, 1]
    b4c = b4.reshape(1, 1).astype(jnp.float32)                    # [1, 1]

    # Weights/biases are resident across the whole grid (constant block index
    # -> DMA'd once); only the x tile and output row are pipelined.
    resident = lambda a: pl.BlockSpec(a.shape, lambda i: (0,) * a.ndim)

    out = pl.pallas_call(
        _mlp_kernel,
        out_shape=jax.ShapeDtypeStruct((1, b_pad), jnp.float32),
        grid=(num_tiles,),
        in_specs=[
            pl.BlockSpec((tile_b, in_size), lambda i: (i, 0)),    # x tile
            resident(w1c), resident(b1c),
            resident(w2c), resident(b2c),
            resident(w3c), resident(b3c),
            resident(w4c), resident(b4c),
        ],
        out_specs=pl.BlockSpec((1, tile_b), lambda i: (0, i)),
        compiler_params=pltpu.CompilerParams(
            # Independent batch tiles: shard across both TensorCores on v7x.
            dimension_semantics=("parallel",),
        ),
    )(x, w1c, b1c, w2c, b2c, w3c, b3c, w4c, b4c)

    return out.reshape(-1)[:B].reshape(B, 1)


def init_params(key, input_size):
    """PyTorch-default Linear init: U(-1/sqrt(fan_in), +1/sqrt(fan_in)).
    Stored in PyTorch layout: W [out, in], b [out]."""
    dims = [(input_size, 64), (64, 32), (32, 16), (16, 1)]
    params = {}
    for idx, (fan_in, fan_out) in enumerate(dims, start=1):
        key, kw, kb = jax.random.split(key, 3)
        bound = 1.0 / (fan_in ** 0.5)
        w = jax.random.uniform(kw, (fan_out, fan_in), jnp.float32, -bound, bound)
        b = jax.random.uniform(kb, (fan_out,), jnp.float32, -bound, bound)
        params[f"l{idx}"] = (w, b)
    return params


def reference_forward(x, params):
    """Pure-JAX f32 reference (HIGHEST matmul precision)."""
    hp = jax.lax.Precision.HIGHEST
    h = x
    for name in ("l1", "l2", "l3"):
        w, b = params[name]
        h = jnp.maximum(jnp.dot(h, w.T, precision=hp) + b, 0.0)
    w, b = params["l4"]
    return jax.nn.sigmoid(jnp.dot(h, w.T, precision=hp) + b)


if __name__ == "__main__":
    key = jax.random.PRNGKey(0)
    input_size = 32
    batch = 8

    kx, kp = jax.random.split(key)
    x = jax.random.normal(kx, (batch, input_size), jnp.float32)
    params = init_params(kp, input_size)
    ref = reference_forward(x, params)

    # f32 compute path (test-only): strict numerical check against reference.
    out_f32 = jax.block_until_ready(
        neural_network_forward(x, params, compute_dtype=jnp.float32))
    assert out_f32.shape == (batch, 1)
    assert jnp.allclose(out_f32, ref, atol=1e-4, rtol=1e-4)

    # Default bf16 MXU-feed path (production setting): loose tolerance.
    out_bf16 = jax.block_until_ready(neural_network_forward(x, params))
    assert out_bf16.shape == (batch, 1)
    assert jnp.allclose(out_bf16, ref, atol=2e-2, rtol=2e-2)

    # Multi-tile + ragged batch (exercises padding, grid > 1, tail slicing).
    batch2 = 300
    x2 = jax.random.normal(jax.random.PRNGKey(1), (batch2, input_size),
                           jnp.float32)
    ref2 = reference_forward(x2, params)
    out2 = jax.block_until_ready(
        neural_network_forward(x2, params, tile_b=128,
                               compute_dtype=jnp.float32))
    assert out2.shape == (batch2, 1)
    assert jnp.allclose(out2, ref2, atol=1e-4, rtol=1e-4)

    # bf16-producer path (x already bf16): zero wrapper passes over x.
    out3 = jax.block_until_ready(
        neural_network_forward(x2.astype(jnp.bfloat16), params))
    assert out3.shape == (batch2, 1)
    assert jnp.allclose(out3, ref2, atol=4e-2, rtol=4e-2)

    print("KERNEL_OK")
</pallas_src>

<mosaic_0001>
module attributes {stable_mosaic.version = 11 : i64} {
  func.func @_mlp_kernel(%arg0: i32, %arg1: memref<128x32xf32, #tpu.memory_space<vmem>>, %arg2: memref<32x64xf32, #tpu.memory_space<vmem>>, %arg3: memref<1x64xf32, #tpu.memory_space<vmem>>, %arg4: memref<64x32xf32, #tpu.memory_space<vmem>>, %arg5: memref<1x32xf32, #tpu.memory_space<vmem>>, %arg6: memref<16x32xf32, #tpu.memory_space<vmem>>, %arg7: memref<16x1xf32, #tpu.memory_space<vmem>>, %arg8: memref<16x1xf32, #tpu.memory_space<vmem>>, %arg9: memref<1x1xf32, #tpu.memory_space<vmem>>, %arg10: memref<1x128xf32, #tpu.memory_space<vmem>>) attributes {dimension_semantics = [#tpu.dimension_semantics<parallel>], iteration_bounds = array<i64: 1>, scalar_prefetch = 0 : i64, scratch_operands = 0 : i64, tpu.core_type = #tpu.core_type<tc>, window_params = [{transform_indices = @transform_0, window_bounds = array<i64: 128, 32>}, {pipeline_mode = #tpu.pipeline_mode<synchronous>, transform_indices = @transform_1, window_bounds = array<i64: 32, 64>}, {pipeline_mode = #tpu.pipeline_mode<synchronous>, transform_indices = @transform_2, window_bounds = array<i64: 1, 64>}, {pipeline_mode = #tpu.pipeline_mode<synchronous>, transform_indices = @transform_3, window_bounds = array<i64: 64, 32>}, {pipeline_mode = #tpu.pipeline_mode<synchronous>, transform_indices = @transform_4, window_bounds = array<i64: 1, 32>}, {pipeline_mode = #tpu.pipeline_mode<synchronous>, transform_indices = @transform_5, window_bounds = array<i64: 16, 32>}, {pipeline_mode = #tpu.pipeline_mode<synchronous>, transform_indices = @transform_6, window_bounds = array<i64: 16, 1>}, {pipeline_mode = #tpu.pipeline_mode<synchronous>, transform_indices = @transform_7, window_bounds = array<i64: 16, 1>}, {pipeline_mode = #tpu.pipeline_mode<synchronous>, transform_indices = @transform_8, window_bounds = array<i64: 1, 1>}, {transform_indices = @transform_9, window_bounds = array<i64: 1, 128>}]} {
    %c0 = arith.constant 0 : index
    %c0_0 = arith.constant 0 : index
    %0 = vector.load %arg1[%c0, %c0_0] : memref<128x32xf32, #tpu.memory_space<vmem>>, vector<128x32xf32>
    %c0_1 = arith.constant 0 : index
    %c0_2 = arith.constant 0 : index
    %1 = vector.load %arg2[%c0_1, %c0_2] : memref<32x64xf32, #tpu.memory_space<vmem>>, vector<32x64xf32>
    %cst = arith.constant dense<0.000000e+00> : vector<128x64xf32>
    %2 = tpu.matmul %0, %1, %cst {dimension_numbers = #tpu.dot_dimension_numbers<[1], [0], [0], [1], [0, 0, 1, 1], [], []>} : vector<128x32xf32>, vector<32x64xf32>, vector<128x64xf32> -> vector<128x64xf32>
    %c0_3 = arith.constant 0 : index
    %c0_4 = arith.constant 0 : index
    %3 = vector.load %arg3[%c0_3, %c0_4] : memref<1x64xf32, #tpu.memory_space<vmem>>, vector<1x64xf32>
    %4 = vector.broadcast %3 : vector<1x64xf32> to vector<128x64xf32>
    %5 = arith.addf %2, %4 : vector<128x64xf32>
    %cst_5 = arith.constant 0.000000e+00 : f32
    %6 = vector.broadcast %cst_5 : f32 to vector<128x64xf32>
    %7 = arith.maximumf %5, %6 : vector<128x64xf32>
    %c0_6 = arith.constant 0 : index
    %c0_7 = arith.constant 0 : index
    %8 = vector.load %arg4[%c0_6, %c0_7] : memref<64x32xf32, #tpu.memory_space<vmem>>, vector<64x32xf32>
    %cst_8 = arith.constant dense<0.000000e+00> : vector<128x32xf32>
    %9 = tpu.matmul %7, %8, %cst_8 {dimension_numbers = #tpu.dot_dimension_numbers<[1], [0], [0], [1], [0, 0, 1, 1], [], []>} : vector<128x64xf32>, vector<64x32xf32>, vector<128x32xf32> -> vector<128x32xf32>
    %c0_9 = arith.constant 0 : index
    %c0_10 = arith.constant 0 : index
    %10 = vector.load %arg5[%c0_9, %c0_10] : memref<1x32xf32, #tpu.memory_space<vmem>>, vector<1x32xf32>
    %11 = vector.broadcast %10 : vector<1x32xf32> to vector<128x32xf32>
    %12 = arith.addf %9, %11 : vector<128x32xf32>
    %cst_11 = arith.constant 0.000000e+00 : f32
    %13 = vector.broadcast %cst_11 : f32 to vector<128x32xf32>
    %14 = arith.maximumf %12, %13 : vector<128x32xf32>
    %c0_12 = arith.constant 0 : index
    %c0_13 = arith.constant 0 : index
    %15 = vector.load %arg6[%c0_12, %c0_13] : memref<16x32xf32, #tpu.memory_space<vmem>>, vector<16x32xf32>
    %cst_14 = arith.constant dense<0.000000e+00> : vector<16x128xf32>
    %16 = tpu.matmul %15, %14, %cst_14 {dimension_numbers = #tpu.dot_dimension_numbers<[1], [1], [0], [0], [0, 0, 1, 0], [], []>} : vector<16x32xf32>, vector<128x32xf32>, vector<16x128xf32> -> vector<16x128xf32>
    %c0_15 = arith.constant 0 : index
    %c0_16 = arith.constant 0 : index
    %17 = vector.load %arg7[%c0_15, %c0_16] : memref<16x1xf32, #tpu.memory_space<vmem>>, vector<16x1xf32>
    %18 = vector.broadcast %17 : vector<16x1xf32> to vector<16x128xf32>
    %19 = arith.addf %16, %18 : vector<16x128xf32>
    %cst_17 = arith.constant 0.000000e+00 : f32
    %20 = vector.broadcast %cst_17 : f32 to vector<16x128xf32>
    %21 = arith.maximumf %19, %20 : vector<16x128xf32>
    %c0_18 = arith.constant 0 : index
    %c0_19 = arith.constant 0 : index
    %22 = vector.load %arg8[%c0_18, %c0_19] : memref<16x1xf32, #tpu.memory_space<vmem>>, vector<16x1xf32>
    %23 = vector.broadcast %22 : vector<16x1xf32> to vector<16x128xf32>
    %24 = arith.mulf %21, %23 : vector<16x128xf32>
    %cst_20 = arith.constant dense<0.000000e+00> : vector<128xf32>
    %25 = vector.multi_reduction <add>, %24, %cst_20 [0] : vector<16x128xf32> to vector<128xf32>
    %26 = vector.shape_cast %25 : vector<128xf32> to vector<1x128xf32>
    %c0_21 = arith.constant 0 : index
    %c0_22 = arith.constant 0 : index
    %27 = vector.load %arg9[%c0_21, %c0_22] : memref<1x1xf32, #tpu.memory_space<vmem>>, vector<1x1xf32>
    %28 = vector.broadcast %27 : vector<1x1xf32> to vector<1x128xf32>
    %29 = arith.addf %26, %28 : vector<1x128xf32>
    %30 = arith.negf %29 : vector<1x128xf32>
    %31 = math.exp %30 : vector<1x128xf32>
    %cst_23 = arith.constant 1.000000e+00 : f32
    %32 = vector.broadcast %cst_23 : f32 to vector<1x128xf32>
    %33 = arith.addf %32, %31 : vector<1x128xf32>
    %34 = arith.divf %32, %33 : vector<1x128xf32>
    %c0_24 = arith.constant 0 : index
    %c0_25 = arith.constant 0 : index
    %35 = vector.load %arg10[%c0_24, %c0_25] : memref<1x128xf32, #tpu.memory_space<vmem>>, vector<1x128xf32>
    tpu.vector_store %arg10[%c0_24, %c0_25], %34 {strides = array<i32>} : memref<1x128xf32, #tpu.memory_space<vmem>>, vector<1x128xf32>,
    return
  }
  func.func @transform_0(%arg0: i32) -> (i32, i32) {
    %c0_i32 = arith.constant 0 : i32
    %c0_i32_0 = arith.constant 0 : i32
    return %arg0, %c0_i32 : i32, i32
  }
  func.func @transform_1(%arg0: i32) -> (i32, i32) {
    %c0_i32 = arith.constant 0 : i32
    %c0_i32_0 = arith.constant 0 : i32
    %c0_i32_1 = arith.constant 0 : i32
    return %c0_i32, %c0_i32_0 : i32, i32
  }
  func.func @transform_2(%arg0: i32) -> (i32, i32) {
    %c0_i32 = arith.constant 0 : i32
    %c0_i32_0 = arith.constant 0 : i32
    %c0_i32_1 = arith.constant 0 : i32
    return %c0_i32, %c0_i32_0 : i32, i32
  }
  func.func @transform_3(%arg0: i32) -> (i32, i32) {
    %c0_i32 = arith.constant 0 : i32
    %c0_i32_0 = arith.constant 0 : i32
    %c0_i32_1 = arith.constant 0 : i32
    return %c0_i32, %c0_i32_0 : i32, i32
  }
  func.func @transform_4(%arg0: i32) -> (i32, i32) {
    %c0_i32 = arith.constant 0 : i32
    %c0_i32_0 = arith.constant 0 : i32
    %c0_i32_1 = arith.constant 0 : i32
    return %c0_i32, %c0_i32_0 : i32, i32
  }
  func.func @transform_5(%arg0: i32) -> (i32, i32) {
    %c0_i32 = arith.constant 0 : i32
    %c0_i32_0 = arith.constant 0 : i32
    %c0_i32_1 = arith.constant 0 : i32
    return %c0_i32, %c0_i32_0 : i32, i32
  }
  func.func @transform_6(%arg0: i32) -> (i32, i32) {
    %c0_i32 = arith.constant 0 : i32
    %c0_i32_0 = arith.constant 0 : i32
    %c0_i32_1 = arith.constant 0 : i32
    return %c0_i32, %c0_i32_0 : i32, i32
  }
  func.func @transform_7(%arg0: i32) -> (i32, i32) {
    %c0_i32 = arith.constant 0 : i32
    %c0_i32_0 = arith.constant 0 : i32
    %c0_i32_1 = arith.constant 0 : i32
    return %c0_i32, %c0_i32_0 : i32, i32
  }
  func.func @transform_8(%arg0: i32) -> (i32, i32) {
    %c0_i32 = arith.constant 0 : i32
    %c0_i32_0 = arith.constant 0 : i32
    %c0_i32_1 = arith.constant 0 : i32
    return %c0_i32, %c0_i32_0 : i32, i32
  }
  func.func @transform_9(%arg0: i32) -> (i32, i32) {
    %c0_i32 = arith.constant 0 : i32
    %c0_i32_0 = arith.constant 0 : i32
    return %c0_i32, %arg0 : i32, i32
  }
}

</mosaic_0001>

<bundles_post_ra>
// kernel: tpu_custom_call.1
= control target key start
LH: loop header
LB: loop body
LE: loop exit
PB: predicated region body
PF: predicated region fallthrough
CT: control target
= control target key end

     0   :  { %s1268_s0 = inlined_call_operand.vmem [shape: f32[128,32], index: 0, kind: input, shape index: {}]   ;;  %s1269_s1 = inlined_call_operand.vmem [shape: f32[32,64], index: 1, kind: input, shape index: {}]   ;;  %s1270_s2 = inlined_call_operand.vmem [shape: f32[1,64], index: 2, kind: input, shape index: {}]   ;;  %s1271_s3 = inlined_call_operand.vmem [shape: f32[64,32], index: 3, kind: input, shape index: {}]   ;;  %s1272_s4 = inlined_call_operand.vmem [shape: f32[1,32], index: 4, kind: input, shape index: {}]   ;;  %s1273_s5 = inlined_call_operand.vmem [shape: f32[16,32], index: 5, kind: input, shape index: {}]   ;;  %s1274_s6 = inlined_call_operand.vmem [shape: f32[16,1], index: 6, kind: input, shape index: {}]   ;;  %s1275_s7 = inlined_call_operand.vmem [shape: f32[16,1], index: 7, kind: input, shape index: {}]   ;;  %s1276_s8 = inlined_call_operand.<no memory space> [shape: f32[1,1], index: 8, kind: input, shape index: {}]   ;;  %s1277_s9 = inlined_call_operand.hbm [shape: f32[1,128], index: 9, kind: output, shape index: {}]  }
   0x1   :  { %v14_v0 = vstv %s1276_s8 }
   0x2   :  { %15 = vst [vmem:[#allocation2] sm:$0x1] %v14_v0 }
   0x3   :  { %v51_v1 = vld [vmem:[%s1269_s1] sm:$0xff]  ;;  %v52_v2 = vld [vmem:[%s1269_s1 + $0x8] sm:$0xff]  ;;  %v53_v3 = vld [vmem:[%s1269_s1 + $0x10] sm:$0xff]  ;;  %vm62_vm0 = vcmask 261120  }
   0x4   :  { %v917_v4 = vpack.c.bf16 %v52_v2, %v51_v1  ;;  %v54_v5 = vld [vmem:[%s1269_s1 + $0x18] sm:$0xff]  ;;  %v35_v6 = vld [vmem:[%s1268_s0] sm:$0xff]  ;;  %v273_v9 = vld [vmem:[%s1271_s3 + $0x8] sm:$0xff] }
   0x5   :  { %v921_v7 = vpack.c.bf16 %v54_v5, %v53_v3  ;;  %818 = vmatprep.mubr.msk.f32.mxu1 %vm62_vm0, %v35_v6  ;;  %v272_v8 = vld [vmem:[%s1271_s3] sm:$0xff]  ;;  %v274_v10 = vld [vmem:[%s1271_s3 + $0x10] sm:$0xff]  ;;  %v275_v11 = vld [vmem:[%s1271_s3 + $0x18] sm:$0xff] }
   0x6   :  { %918 = vmatprep.subr.bf16.mxu1 %v917_v4  ;;  %v36_v12 = vld [vmem:[%s1268_s0 + $0x8] sm:$0xff]  ;;  %v925_v13 = vpack.c.bf16 %v273_v9, %v272_v8  ;;  %v37_v14 = vld [vmem:[%s1268_s0 + $0x10] sm:$0xff]  ;;  %v929_v15 = vpack.c.bf16 %v275_v11, %v274_v10 }
   0x7   :  { %920 = vmatpush3.bf16.msra.mxu1 %v917_v4 }
   0x8   :  { %922 = vmatprep.subr.bf16.mxu1 %v921_v7 }
   0xb   :  { %924 = vmatpush3.bf16.msra.mxu1 %v921_v7 }
   0xc   :  { %16 = vsyncpa [#allocation4], 0  ;;  %926 = vmatprep.subr.bf16.mxu1 %v925_v13  ;;  %v276_v16 = vld [vmem:[%s1271_s3 + $0x20] sm:$0xff]  ;;  %v277_v17 = vld [vmem:[%s1271_s3 + $0x28] sm:$0xff]  ;;  %vm287_vm1 = vcmask 523264  }
   0xd   :  { %v38_v18 = vld [vmem:[%s1268_s0 + $0x18] sm:$0xff]  ;;  %v39_v19 = vld [vmem:[%s1268_s0 + $0x20] sm:$0xff]  ;;  %v933_v20 = vpack.c.bf16 %v277_v17, %v276_v16  ;;  %v278_v21 = vld [vmem:[%s1271_s3 + $0x30] sm:$0xff] }
   0xe   :  { %819 = vmatmul.mubr.msk.f32.vlgmr.msra.gmra.mrb[0].mxu1 %vm62_vm0, %v36_v12  ;;  %v279_v22 = vld [vmem:[%s1271_s3 + $0x38] sm:$0xff]  ;;  %v40_v23 = vld [vmem:[%s1268_s0 + $0x28] sm:$0xff]  ;;  %v41_v24 = vld [vmem:[%s1268_s0 + $0x30] sm:$0xff] }
   0xf   :  { %821 = vmatprep.mubr.msk.f32.mxu1 %vm62_vm0, %v37_v14  ;;  %928 = vmatpush3.bf16.msra.mxu1 %v925_v13  ;;  %v937_v25 = vpack.c.bf16 %v279_v22, %v278_v21  ;;  %v42_v26 = vld [vmem:[%s1268_s0 + $0x38] sm:$0xff]  ;;  %v43_v27 = vld [vmem:[%s1268_s0 + $0x40] sm:$0xff]  ;;  %v44_v28 = vld [vmem:[%s1268_s0 + $0x48] sm:$0xff] }
  0x10   :  { %930 = vmatprep.subr.bf16.mxu1 %v929_v15  ;;  %v45_v29 = vld [vmem:[%s1268_s0 + $0x50] sm:$0xff]  ;;  %v46_v30 = vld [vmem:[%s1268_s0 + $0x58] sm:$0xff]  ;;  %v47_v31 = vld [vmem:[%s1268_s0 + $0x60] sm:$0xff] }
  0x11   :  { %v48_v32 = vld [vmem:[%s1268_s0 + $0x68] sm:$0xff]  ;;  %v49_v33 = vld [vmem:[%s1268_s0 + $0x70] sm:$0xff]  ;;  %v50_v34 = vld [vmem:[%s1268_s0 + $0x78] sm:$0xff] }
  0x12   :  { %822 = vmatmul.mubr.msk.f32.gmra.mrb[2].mxu1 %vm62_vm0, %v38_v18  ;;  %v695_v35 = vld [vmem:[%s1270_s2] ss:$0 sm:$0xff]  ;;  %vm1216_vm2 = vmpackc.low %vm62_vm0, %vm62_vm0 }
  0x13   :  { %824 = vmatprep.mubr.msk.f32.mxu1 %vm62_vm0, %v39_v19  ;;  %932 = vmatpush3.bf16.msra.mxu1 %v929_v15  ;;  %v499_v21 = vld [vmem:[%s1274_s6] sm:$0xff] }
  0x14   :  { %934 = vmatprep.subr.bf16.mxu1 %v933_v20  ;;  %v642_v22 = vld [vmem:[%s1275_s7] sm:$0xff] }
  0x16   :  { %825 = vmatmul.mubr.msk.f32.gmra.mrb[4].mxu1 %vm62_vm0, %v40_v23  ;;  %v1021_v23 = vmov 0  }
  0x17   :  { %827 = vmatprep.mubr.msk.f32.mxu1 %vm62_vm0, %v41_v24  ;;  %936 = vmatpush3.bf16.msra.mxu1 %v933_v20  ;;  %v497_v20 = vld [vmem:[%s1273_s5] sm:$0xff]  ;;  %v500_v24 = vld [vmem:[%s1274_s6 + $0x8] sm:$0xff] }
  0x18   :  { %938 = vmatprep.subr.bf16.mxu1 %v937_v25  ;;  %914 = vmatprep.mubr.msk.f32.mxu0 %vm62_vm0, %v497_v20 }
  0x19   :  { %991 = vset.pattern.permute.xlu0 %v1021_v23  ;;  %992 = vset.pattern.permute.xlu1 %v1021_v23 }
  0x1a   :  { %828 = vmatmul.mubr.msk.f32.gmra.mrb[6].mxu1 %vm62_vm0, %v42_v26  ;;  %503 = vperm.xlu0 %991, %v499_v21   ;;  %v663_v26 = vld [vmem:[#allocation2] sm:$0x1]  ;;  %v498_v21 = vld [vmem:[%s1273_s5 + $0x8] sm:$0xff]  ;;  %s1022_s5 = smov [#allocation3]  }
  0x1b   :  { %830 = vmatprep.mubr.msk.f32.mxu1 %vm62_vm0, %v43_v27  ;;  %940 = vmatpush3.bf16.msra.mxu1 %v937_v25  ;;  %v643_v25 = vld [vmem:[%s1275_s7 + $0x8] sm:$0xff]  ;;  %v712_v27 = vld [vmem:[%s1272_s4] ss:$0 sm:$0xff]  ;;  %s687_s7 = sshll.u32 %s1022_s5, 4  ;;  %s688_s7 = int_to_ptr.vmem [resolvable:$true] %s687_s7 }
  0x1c   :  { %646 = vperm.xlu1 %992, %v642_v22   ;;  %s997_s29 = scalar_lea.vmem %s688_s7, 16  ;;  %s1001_s30 = scalar_lea.vmem %s688_s7, 32 }
  0x1d   :  { %p998_p0 = scmp.ne.s32.totalorder %s688_s7, %s997_s29  ;;  %p1002_p1 = scmp.lt.s32.totalorder %s688_s7, %s688_s7 }
  0x1e   :  { %831 = vmatmul.mubr.msk.f32.gmra.mrb[8].mxu1 %vm62_vm0, %v44_v28  ;;  %508 = vperm.xlu0 %991, %v500_v24   ;;  %p1003_p2 = scmp.lt.s32.totalorder %s1001_s30, %s997_s29 }
  0x1f   :  { %833 = vmatprep.mubr.msk.f32.mxu1 %vm62_vm0, %v45_v29 }
  0x20   :  { %651 = vperm.xlu1 %992, %v643_v25   ;;  %p1004_p3 = por %p1003_p2, %p1002_p1 }
  0x22   :  { %834 = vmatmul.mubr.msk.f32.gmra.mrb[10].mxu1 %vm62_vm0, %v46_v30  ;;  %666 = vperm.xlu0 %991, %v663_v26   ;;  %p1005_p4 = pnand %p1004_p3, %p998_p0 }
  0x23   :  { %836 = vmatprep.mubr.msk.f32.mxu1 %vm62_vm0, %v47_v31 }
  0x26   :  { %837 = vmatmul.mubr.msk.f32.gmra.mrb[12].mxu1 %vm62_vm0, %v48_v32 }
  0x27   :  { %839 = vmatprep.mubr.msk.f32.mxu1 %vm62_vm0, %v49_v33 }
  0x2a   :  { %840 = vmatmul.mubr.msk.f32.gmra.mrb[14].mxu1 %vm62_vm0, %v50_v34 }
  0x99   :  { %v504_v22 = vpop.permute.xlu0 %503 }
  0x9b   :  { %v647_v23 = vpop.permute.xlu1 %646 }
  0x9d   :  { %v509_v24 = vpop.permute.xlu0 %508 }
  0xe1   :  { %v820_v36 = vpop.f32.mrb[0].mxu1 }
  0xe2   :  { %v183_v37 = vadd.f32 %v820_v36, %v695_v35  ;;  %v177_v38 = vpop.f32.mrb[1].mxu1 }
  0xe3   :  { %v178_v39 = vadd.f32 %v695_v35, %v177_v38 }
  0xe4   :  { %v257_v42 = vmax.f32 %v183_v37, 0.0 }
  0xe5   :  { %v256_v40 = vmax.f32 %v178_v39, 0.0  ;;  %v823_v41 = vpop.f32.mrb[2].mxu1 }
  0xe6   :  { %v193_v43 = vadd.f32 %v823_v41, %v695_v35  ;;  %v187_v44 = vpop.f32.mrb[3].mxu1 }
  0xe7   :  { %v188_v45 = vadd.f32 %v695_v35, %v187_v44  ;;  %858 = vmatprep.mubr.msk.f32.mxu1 %vm287_vm1, %v256_v40 }
  0xe8   :  { %v259_v46 = vmax.f32 %v193_v43, 0.0  ;;  %859 = vmatmul.mubr.msk.f32.vlgmr.msra.gmra.mrb[16].mxu1 %vm287_vm1, %v257_v42 }
  0xe9   :  { %v258_v47 = vmax.f32 %v188_v45, 0.0  ;;  %v826_v48 = vpop.f32.mrb[4].mxu1 }
  0xea   :  { %v203_v49 = vadd.f32 %v826_v48, %v695_v35  ;;  %v197_v50 = vpop.f32.mrb[5].mxu1 }
  0xeb   :  { %861 = vmatprep.mubr.msk.f32.mxu1 %vm287_vm1, %v258_v47  ;;  %v198_v51 = vadd.f32 %v695_v35, %v197_v50 }
  0xec   :  { %862 = vmatmul.mubr.msk.f32.gmra.mrb[18].mxu1 %vm287_vm1, %v259_v46  ;;  %v261_v52 = vmax.f32 %v203_v49, 0.0 }
  0xed   :  { %v260_v53 = vmax.f32 %v198_v51, 0.0  ;;  %v829_v54 = vpop.f32.mrb[6].mxu1 }
  0xee   :  { %v213_v55 = vadd.f32 %v829_v54, %v695_v35  ;;  %v207_v56 = vpop.f32.mrb[7].mxu1 }
  0xef   :  { %864 = vmatprep.mubr.msk.f32.mxu1 %vm287_vm1, %v260_v53  ;;  %v208_v57 = vadd.f32 %v695_v35, %v207_v56 }
  0xf0   :  { %865 = vmatmul.mubr.msk.f32.gmra.mrb[20].mxu1 %vm287_vm1, %v261_v52  ;;  %v263_v58 = vmax.f32 %v213_v55, 0.0 }
  0xf1   :  { %v262_v59 = vmax.f32 %v208_v57, 0.0  ;;  %v832_v60 = vpop.f32.mrb[8].mxu1 }
  0xf2   :  { %v223_v61 = vadd.f32 %v832_v60, %v695_v35  ;;  %v217_v62 = vpop.f32.mrb[9].mxu1 }
  0xf3   :  { %867 = vmatprep.mubr.msk.f32.mxu1 %vm287_vm1, %v262_v59  ;;  %v218_v63 = vadd.f32 %v695_v35, %v217_v62 }
  0xf4   :  { %868 = vmatmul.mubr.msk.f32.gmra.mrb[22].mxu1 %vm287_vm1, %v263_v58  ;;  %v265_v0 = vmax.f32 %v223_v61, 0.0 }
  0xf5   :  { %v264_v1 = vmax.f32 %v218_v63, 0.0  ;;  %v835_v2 = vpop.f32.mrb[10].mxu1 }
  0xf6   :  { %v233_v3 = vadd.f32 %v835_v2, %v695_v35  ;;  %v227_v4 = vpop.f32.mrb[11].mxu1 }
  0xf7   :  { %870 = vmatprep.mubr.msk.f32.mxu1 %vm287_vm1, %v264_v1  ;;  %v228_v5 = vadd.f32 %v695_v35, %v227_v4 }
  0xf8   :  { %871 = vmatmul.mubr.msk.f32.gmra.mrb[24].mxu1 %vm287_vm1, %v265_v0  ;;  %v267_v6 = vmax.f32 %v233_v3, 0.0 }
  0xf9   :  { %v266_v7 = vmax.f32 %v228_v5, 0.0  ;;  %v838_v8 = vpop.f32.mrb[12].mxu1 }
  0xfa   :  { %v243_v9 = vadd.f32 %v838_v8, %v695_v35  ;;  %v237_v10 = vpop.f32.mrb[13].mxu1 }
  0xfb   :  { %873 = vmatprep.mubr.msk.f32.mxu1 %vm287_vm1, %v266_v7  ;;  %v238_v11 = vadd.f32 %v695_v35, %v237_v10 }
  0xfc   :  { %874 = vmatmul.mubr.msk.f32.gmra.mrb[26].mxu1 %vm287_vm1, %v267_v6  ;;  %v269_v12 = vmax.f32 %v243_v9, 0.0 }
  0xfd   :  { %v268_v13 = vmax.f32 %v238_v11, 0.0  ;;  %v841_v14 = vpop.f32.mrb[14].mxu1 }
  0xfe   :  { %v253_v15 = vadd.f32 %v841_v14, %v695_v35  ;;  %v247_v16 = vpop.f32.mrb[15].mxu1 }
  0xff   :  { %876 = vmatprep.mubr.msk.f32.mxu1 %vm287_vm1, %v268_v13  ;;  %v248_v17 = vadd.f32 %v695_v35, %v247_v16 }
 0x100   :  { %877 = vmatmul.mubr.msk.f32.gmra.mrb[28].mxu1 %vm287_vm1, %v269_v12  ;;  %v271_v18 = vmax.f32 %v253_v15, 0.0 }
 0x101   :  { %v270_v19 = vmax.f32 %v248_v17, 0.0 }
 0x103   :  { %879 = vmatprep.mubr.msk.f32.mxu1 %vm287_vm1, %v270_v19 }
 0x104   :  { %880 = vmatmul.mubr.msk.f32.gmra.mrb[30].mxu1 %vm287_vm1, %v271_v18 }
 0x1bb   :  { %v860_v28 = vpop.f32.mrb[16].mxu1 }
 0x1bc   :  { %v408_v29 = vadd.f32 %v860_v28, %v712_v27  ;;  %v402_v30 = vpop.f32.mrb[17].mxu1 }
 0x1bd   :  { %v403_v31 = vadd.f32 %v712_v27, %v402_v30  ;;  %v652_v30 = vpop.permute.xlu1 %651 }
 0x1be   :  { %v482_v32 = vmax.f32 %v408_v29, 0.0 }
 0x1bf   :  { %v481_v33 = vmax.f32 %v403_v31, 0.0  ;;  %v863_v34 = vpop.f32.mrb[18].mxu1 }
 0x1c0   :  { %v418_v35 = vadd.f32 %v863_v34, %v712_v27  ;;  %v412_v36 = vpop.f32.mrb[19].mxu1  ;;  %v669_v34 = vlaneseq }
 0x1c1   :  { %v413_v38 = vadd.f32 %v712_v27, %v412_v36  ;;  %v941_v39 = vpack.c.bf16 %v482_v32, %v481_v33 }
 0x1c2   :  { %v484_v40 = vmax.f32 %v418_v35, 0.0  ;;  %v670_v37 = vshrl.u32 %v669_v34, 7 }
 0x1c3   :  { %v483_v41 = vmax.f32 %v413_v38, 0.0  ;;  %943 = vmatprep.subr.msk.bf16.mxu0 %vm1216_vm2, %v941_v39  ;;  %v866_v42 = vpop.f32.mrb[20].mxu1 }
 0x1c4   :  { %946 = vmatpush3.bf16.xpose.msk.msra.mxu0 %vm1216_vm2, %v941_v39  ;;  %v428_v43 = vadd.f32 %v866_v42, %v712_v27  ;;  %v422_v44 = vpop.f32.mrb[21].mxu1  ;;  %v667_v42 = vpop.permute.xlu0 %666 }
 0x1c5   :  { %v947_v45 = vpack.c.bf16 %v484_v40, %v483_v41  ;;  %v423_v46 = vadd.f32 %v712_v27, %v422_v44  ;;  %v671_v40 = vsub.s32 0, %v670_v37 }
 0x1c6   :  { %v486_v47 = vmax.f32 %v428_v43, 0.0 }
 0x1c7   :  { %949 = vmatprep.subr.msk.bf16.mxu0 %vm1216_vm2, %v947_v45  ;;  %v485_v48 = vmax.f32 %v423_v46, 0.0  ;;  %v869_v49 = vpop.f32.mrb[22].mxu1  ;;  %v672_v44 = vrot.slane %v667_v42, %v671_v40 }
 0x1c8   :  { %v438_v50 = vadd.f32 %v869_v49, %v712_v27  ;;  %v432_v51 = vpop.f32.mrb[23].mxu1 }
 0x1c9   :  { %v953_v52 = vpack.c.bf16 %v486_v47, %v485_v48  ;;  %v433_v53 = vadd.f32 %v712_v27, %v432_v51 }
 0x1ca   :  { %v488_v54 = vmax.f32 %v438_v50, 0.0 }
 0x1cb   :  { %v487_v55 = vmax.f32 %v433_v53, 0.0  ;;  %v872_v56 = vpop.f32.mrb[24].mxu1 }
 0x1cc   :  { %952 = vmatpush3.bf16.xpose.msk.msra.mxu0 %vm1216_vm2, %v947_v45  ;;  %v448_v57 = vadd.f32 %v872_v56, %v712_v27  ;;  %v442_v58 = vpop.f32.mrb[25].mxu1 }
 0x1cd   :  { %955 = vmatprep.subr.msk.bf16.mxu0 %vm1216_vm2, %v953_v52  ;;  %v959_v59 = vpack.c.bf16 %v488_v54, %v487_v55  ;;  %v443_v60 = vadd.f32 %v712_v27, %v442_v58 }
 0x1ce   :  { %v490_v61 = vmax.f32 %v448_v57, 0.0 }
 0x1cf   :  { %v489_v62 = vmax.f32 %v443_v60, 0.0  ;;  %v875_v63 = vpop.f32.mrb[26].mxu1 }
 0x1d0   :  { %v458_v0 = vadd.f32 %v875_v63, %v712_v27  ;;  %v452_v1 = vpop.f32.mrb[27].mxu1 }
 0x1d1   :  { %v965_v2 = vpack.c.bf16 %v490_v61, %v489_v62  ;;  %v453_v3 = vadd.f32 %v712_v27, %v452_v1 }
 0x1d2   :  { %v492_v4 = vmax.f32 %v458_v0, 0.0 }
 0x1d3   :  { %v491_v5 = vmax.f32 %v453_v3, 0.0  ;;  %v878_v6 = vpop.f32.mrb[28].mxu1 }
 0x1d4   :  { %958 = vmatpush3.bf16.xpose.msk.msra.mxu0 %vm1216_vm2, %v953_v52  ;;  %v468_v7 = vadd.f32 %v878_v6, %v712_v27  ;;  %v462_v8 = vpop.f32.mrb[29].mxu1 }
 0x1d5   :  { %961 = vmatprep.subr.msk.bf16.mxu0 %vm1216_vm2, %v959_v59  ;;  %v971_v9 = vpack.c.bf16 %v492_v4, %v491_v5  ;;  %v463_v10 = vadd.f32 %v712_v27, %v462_v8 }
 0x1d6   :  { %v494_v11 = vmax.f32 %v468_v7, 0.0 }
 0x1d7   :  { %v493_v12 = vmax.f32 %v463_v10, 0.0  ;;  %v881_v13 = vpop.f32.mrb[30].mxu1 }
 0x1d8   :  { %v478_v14 = vadd.f32 %v881_v13, %v712_v27  ;;  %v472_v15 = vpop.f32.mrb[31].mxu1 }
 0x1d9   :  { %v977_v16 = vpack.c.bf16 %v494_v11, %v493_v12  ;;  %v473_v17 = vadd.f32 %v712_v27, %v472_v15 }
 0x1da   :  { %v496_v18 = vmax.f32 %v478_v14, 0.0 }
 0x1db   :  { %v495_v19 = vmax.f32 %v473_v17, 0.0 }
 0x1dc   :  { %964 = vmatpush3.bf16.xpose.msk.msra.mxu0 %vm1216_vm2, %v959_v59 }
 0x1dd   :  { %967 = vmatprep.subr.msk.bf16.mxu0 %vm1216_vm2, %v965_v2  ;;  %v983_v20 = vpack.c.bf16 %v496_v18, %v495_v19 }
 0x1e4   :  { %970 = vmatpush3.bf16.xpose.msk.msra.mxu0 %vm1216_vm2, %v965_v2 }
 0x1e5   :  { %973 = vmatprep.subr.msk.bf16.mxu0 %vm1216_vm2, %v971_v9 }
 0x1ec   :  { %976 = vmatpush3.bf16.xpose.msk.msra.mxu0 %vm1216_vm2, %v971_v9 }
 0x1ed   :  { %979 = vmatprep.subr.msk.bf16.mxu0 %vm1216_vm2, %v977_v16 }
 0x1f4   :  { %982 = vmatpush3.bf16.xpose.msk.msra.mxu0 %vm1216_vm2, %v977_v16 }
 0x1f5   :  { %985 = vmatprep.subr.msk.bf16.mxu0 %vm1216_vm2, %v983_v20 }
 0x1fc   :  { %988 = vmatpush3.bf16.xpose.msk.msra.mxu0 %vm1216_vm2, %v983_v20 }
 0x203   :  { %915 = vmatmul.mubr.msk.f32.vlgmr.msra.gmra.mrb[0].mxu0 %vm62_vm0, %v498_v21 }
 0x2d6   :  { %v916_v25 = vpop.f32.mrb[0].mxu0 }
 0x2d7   :  { %v637_v26 = vadd.f32 %v916_v25, %v509_v24  ;;  %v631_v27 = vpop.f32.mrb[1].mxu0 }
 0x2d8   :  { %v632_v28 = vadd.f32 %v631_v27, %v504_v22 }
 0x2d9   :  { %v641_v29 = vmax.f32 %v637_v26, 0.0 }
 0x2da   :  { %v640_v31 = vmax.f32 %v632_v28, 0.0 }
 0x2db   :  { %v655_v32 = vmul.f32 %v652_v30, %v641_v29 }
 0x2dc   :  { %v654_v33 = vmul.f32 %v647_v23, %v640_v31 }
 0x2de   :  { %v656_v35 = vadd.f32 %v655_v32, %v654_v33 }
 0x2e0   :  { %v657_v36 = vrot.slane %v656_v35, 4 }
 0x2e2   :  { %v658_v38 = vadd.f32 %v657_v36, %v656_v35 }
 0x2e4   :  { %v659_v39 = vrot.slane %v658_v38, 2 }
 0x2e6   :  { %v660_v41 = vadd.f32 %v659_v39, %v658_v38 }
 0x2e8   :  { %v661_v43 = vrot.slane %v660_v41, 1 }
 0x2ea   :  { %v662_v45 = vadd.f32 %v661_v43, %v660_v41 }
 0x2ec   :  { %v673_v46 = vadd.f32 %v672_v44, %v662_v45 }
 0x2ee   :  { %v747_v47 = vmul.f32 -1.442695, %v673_v46 }
 0x2f0   :  { %993 = vpow2.f32 %v747_v47 }
 0x2fa   :  { %v994_v48 = vpop.eup %993 }
 0x2fb   :  { %v677_v49 = vadd.f32 1.0, %v994_v48 }
 0x2fd   :  { %995 = vrcp.f32 %v677_v49 }
 0x307   :  { %v996_v50 = vpop.eup %995 }
 0x308   :  { %680 = vst [vmem:[#allocation3] sm:$0x1] %v996_v50 }
 0x309   :  { %1008 = shalt.err (!%p1005_p4)
}
 0x30a   :  { %s1009_s12 = scalar_lea.hbm %s1277_s9, 16 }
 0x30b   :  { %p1010_p5 = scmp.ne.s32.totalorder %s1277_s9, %s1009_s12  ;;  %p1013_p6 = scmp.lt.u32.totalorder %s1009_s12, %s1277_s9 }
 0x30d   :  { %p1015_p7 = pnand %p1013_p6, %p1010_p5 }
 0x30f   :  { %1018 = shalt.err (!%p1015_p7)
}
 0x310   :  { %690 = dma.vmem_to_hbm [thread:$0]  %s688_s7, 16, %s1277_s9, [#allocation4]  }
 0x311   :  { %1019 = dma.done.wait [#allocation4], 16  }
 0x312   :  { %1020 = vsyncadd [#allocation4], 4294967280 }
 0x313   :  { %694 = vsyncpa [#allocation4], 1 }

</bundles_post_ra>
